<compile_context>
chip_gen: v7x
topology: tpu7x:2x2x1
jax: 0.10.0
libtpu: 0.0.40
codegen_flags: <defaults>
</compile_context>

<pallas_src>
import functools

import jax
import jax.numpy as jnp
from jax.experimental import pallas as pl
from jax.experimental.pallas import tpu as pltpu

_EPS = 1e-5


def _dense_block_kernel(*refs, num_layers, c0, growth):
    """Whole _DenseBlock for one batch element, fully fused in VMEM.

    refs layout:
      refs[0]                  : x   (1, L, C0)                    f32
      refs[1 + 4*k + 0..3]     : layer-k params
          sb1 (2, Cin_k) f32   BN1 scale/bias stacked
          w1  (Cin_k, Cmid)    1x1-conv weight, BN2 scale folded in (bf16/f32)
          b2  (1, Cmid)  f32   BN2 bias
          w2  (Cmid, 3*G)      k=3 taps [W0^T | W1^T | W2^T]       (bf16/f32)
      refs[-1]                 : out (1, L, C0 + num_layers*G)     f32
    """
    x_ref, out_ref = refs[0], refs[-1]
    params = refs[1:-1]
    L = x_ref.shape[1]
    G = growth

    # Seed the persistent output slab (VMEM) with the block input.  Every layer
    # reads its input prefix from out_ref and writes its new channels in place.
    out_ref[0, :, pl.ds(0, c0)] = x_ref[0].astype(out_ref.dtype)

    # k=3 conv boundary masks, hoisted out of the unrolled layer loop.
    row = jax.lax.broadcasted_iota(jnp.int32, (L, G), 0)
    mask_prev = row >= 1          # row 0 has no left neighbor
    mask_next = row <= L - 2      # row L-1 has no right neighbor

    cin = c0
    for k in range(num_layers):                       # unrolled at trace time
        sb1_ref, w1_ref, b2_ref, w2_ref = params[4 * k:4 * k + 4]
        wdt = w1_ref.dtype

        # BatchNorm1d (eval mode, folded scale/bias) + ReLU, f32 on the VPU.
        feats = out_ref[0, :, pl.ds(0, cin)]                     # (L, Cin_k)
        sb1 = sb1_ref[...]                                       # (2, Cin_k)
        h = jnp.maximum(feats * sb1[0:1, :] + sb1[1:2, :], 0.0)

        # Conv1d k=1 (no bias) == channel matmul on the MXU, f32 accumulation.
        # BN2's scale is already folded into w1's columns; only bias remains.
        m = jnp.dot(h.astype(wdt), w1_ref[...],
                    preferred_element_type=jnp.float32)          # (L, Cmid)
        m = jnp.maximum(m + b2_ref[...], 0.0)

        # Conv1d k=3, padding=1 (no bias):
        #   y[l] = m[l-1] @ W0 + m[l] @ W1 + m[l+1] @ W2
        # One MXU dot against the tap-concatenated weight, then shift/mask the
        # G-wide result slices along L (XLU rolls use non-negative shifts).
        t = jnp.dot(m.astype(wdt), w2_ref[...],
                    preferred_element_type=jnp.float32)          # (L, 3*G)
        y = t[:, G:2 * G]
        y = y + jnp.where(mask_prev,
                          pltpu.roll(t[:, 0:G], shift=1, axis=0), 0.0)
        y = y + jnp.where(mask_next,
                          pltpu.roll(t[:, 2 * G:3 * G], shift=L - 1, axis=0),
                          0.0)

        # torch.cat([x, y], dim=1): write the G new channels in place.
        out_ref[0, :, pl.ds(cin, G)] = y.astype(out_ref.dtype)
        cin += G


def _vmem_limit_bytes():
    """Generation-aware scoped-VMEM limit (~3/4 of physical, capped at 64 MiB)."""
    try:
        cap = int(pltpu.get_tpu_info().vmem_capacity_bytes)
    except Exception:
        return None                    # fall back to the compiler default
    return min(64 * 1024 * 1024, (cap * 3) // 4)


def dense_block_forward_nlc(x_nlc, layers_kparams, vmem_limit_bytes=None):
    """_DenseBlock.forward on channels-last input: (N, L, C0) -> (N, L, C_out)."""
    num_layers = len(layers_kparams)
    N, L, C0 = x_nlc.shape
    G = layers_kparams[0][3].shape[1] // 3
    C_final = C0 + num_layers * G

    if vmem_limit_bytes is None:
        vmem_limit_bytes = _vmem_limit_bytes()

    flat_params = []
    in_specs = [pl.BlockSpec((1, L, C0), lambda n: (n, 0, 0))]
    for kp in layers_kparams:
        for p in kp:                              # every param is 2D, full block
            flat_params.append(p)
            in_specs.append(pl.BlockSpec(p.shape, lambda n: (0, 0)))

    kernel = functools.partial(_dense_block_kernel, num_layers=num_layers,
                               c0=C0, growth=G)

    return pl.pallas_call(
        kernel,
        out_shape=jax.ShapeDtypeStruct((N, L, C_final), jnp.float32),
        grid_spec=pltpu.PrefetchScalarGridSpec(
            num_scalar_prefetch=0,
            grid=(N,),                             # batch axis only
            in_specs=in_specs,
            out_specs=pl.BlockSpec((1, L, C_final), lambda n: (n, 0, 0)),
        ),
        compiler_params=pltpu.CompilerParams(
            dimension_semantics=("parallel",),
            vmem_limit_bytes=vmem_limit_bytes),
    )(x_nlc, *flat_params)


def dense_block_forward(x_ncl, layers_kparams, vmem_limit_bytes=None):
    """PyTorch-facing NCL interface: (N, C0, L) -> (N, C0 + num_layers*G, L).

    The NCL<->NLC transposes are wrapper-side layout plumbing; run the
    surrounding model channels-last (use dense_block_forward_nlc) to avoid the
    extra HBM round trips they cost.
    """
    x_nlc = jnp.transpose(x_ncl, (0, 2, 1))             # NCL -> NLC
    out_nlc = dense_block_forward_nlc(x_nlc, layers_kparams, vmem_limit_bytes)
    return jnp.transpose(out_nlc, (0, 2, 1))            # NLC -> NCL


# ----------------------------------------------------------------------------
# Parameter construction + pure-JAX f32 reference (for verification only)
# ----------------------------------------------------------------------------
def _fold_bn(gamma, beta, mean, var):
    scale = gamma / jnp.sqrt(var + _EPS)
    bias = beta - mean * scale
    return scale, bias


def make_layer_params(key, cin, growth_rate, bn_size):
    """Random eval-mode parameters for one _DenseLayer (PyTorch layout)."""
    cmid = bn_size * growth_rate
    ks = jax.random.split(key, 10)
    gamma1 = jax.random.uniform(ks[0], (cin,), minval=0.5, maxval=1.5)
    beta1 = 0.1 * jax.random.normal(ks[1], (cin,))
    mean1 = 0.1 * jax.random.normal(ks[2], (cin,))
    var1 = jax.random.uniform(ks[3], (cin,), minval=0.5, maxval=1.5)
    w1 = 0.2 * jax.random.normal(ks[4], (cmid, cin))             # Conv1d k=1
    gamma2 = jax.random.uniform(ks[5], (cmid,), minval=0.5, maxval=1.5)
    beta2 = 0.1 * jax.random.normal(ks[6], (cmid,))
    mean2 = 0.1 * jax.random.normal(ks[7], (cmid,))
    var2 = jax.random.uniform(ks[8], (cmid,), minval=0.5, maxval=1.5)
    w2 = 0.2 * jax.random.normal(ks[9], (growth_rate, cmid, 3))  # Conv1d k=3

    s1, b1 = _fold_bn(gamma1, beta1, mean1, var1)
    s2, b2 = _fold_bn(gamma2, beta2, mean2, var2)
    return (s1, b1, w1, s2, b2, w2)


def to_kernel_params(raw, weight_dtype=jnp.bfloat16):
    """Host-side repack into the kernel's channels-last layout.

      sb1: (2, Cin)      BN1 scale/bias stacked (one DMA instead of two)
      w1k: (Cin, Cmid)   1x1-conv weight with BN2 scale folded into its columns
      b2k: (1, Cmid)     BN2 bias
      w2k: (Cmid, 3*G)   [W0^T | W1^T | W2^T] so the k=3 conv is one MXU dot
    """
    s1, b1, w1, s2, b2, w2 = raw
    cmid = s2.shape[0]
    sb1 = jnp.stack([s1, b1], axis=0)
    w1k = (jnp.transpose(w1, (1, 0)) * s2[None, :]).astype(weight_dtype)
    b2k = b2.reshape(1, cmid)
    w2k = jnp.concatenate(
        [jnp.transpose(w2[:, :, t], (1, 0)) for t in range(3)],
        axis=1).astype(weight_dtype)
    return (sb1, w1k, b2k, w2k)


def ref_dense_layer(x_ncl, raw):
    s1, b1, w1, s2, b2, w2 = raw
    h = jnp.maximum(x_ncl * s1[None, :, None] + b1[None, :, None], 0.0)
    m = jnp.einsum('ncl,mc->nml', h, w1)
    m = jnp.maximum(m * s2[None, :, None] + b2[None, :, None], 0.0)
    mp = jnp.pad(m, ((0, 0), (0, 0), (1, 1)))
    L = x_ncl.shape[-1]
    y = sum(jnp.einsum('ncl,gc->ngl', mp[:, :, k:k + L], w2[:, :, k])
            for k in range(3))
    return jnp.concatenate([x_ncl, y], axis=1)


def ref_dense_block(x_ncl, raw_params):
    for raw in raw_params:
        x_ncl = ref_dense_layer(x_ncl, raw)
    return x_ncl


if __name__ == "__main__":
    num_layers, num_input_features, bn_size, growth_rate = 3, 8, 2, 4
    N, L = 2, 16

    key = jax.random.PRNGKey(0)
    key, xkey = jax.random.split(key)
    x = jax.random.normal(xkey, (N, num_input_features, L), dtype=jnp.float32)

    raw_params = []
    cin = num_input_features
    for _ in range(num_layers):
        key, lkey = jax.random.split(key)
        raw_params.append(make_layer_params(lkey, cin, growth_rate, bn_size))
        cin += growth_rate

    ref = ref_dense_block(x, raw_params)
    out_shape = (N, num_input_features + num_layers * growth_rate, L)

    # 1) f32-weight run: tighter tolerance catches tap/channel-ordering bugs
    #    that the bf16-level tolerance could hide.
    kern_f32 = [to_kernel_params(r, jnp.float32) for r in raw_params]
    out_f32 = jax.block_until_ready(dense_block_forward(x, kern_f32))
    assert out_f32.shape == out_shape
    assert jnp.allclose(out_f32, ref, atol=2e-2, rtol=2e-2), "f32 mismatch"

    # 2) Production path: bf16 MXU weights/activations, f32 accumulation.
    kern_bf16 = [to_kernel_params(r, jnp.bfloat16) for r in raw_params]
    out = jax.block_until_ready(dense_block_forward(x, kern_bf16))
    assert out.shape == out_shape
    assert jnp.allclose(out, ref, atol=1e-1, rtol=1e-1), "bf16 mismatch"

    print("KERNEL_OK")
</pallas_src>

<mosaic_0001>
module attributes {stable_mosaic.version = 11 : i64} {
  func.func @_dense_block_kernel(%arg0: i32, %arg1: memref<1x16x8xf32, #tpu.memory_space<vmem>>, %arg2: memref<2x8xf32, #tpu.memory_space<vmem>>, %arg3: memref<8x8xf32, #tpu.memory_space<vmem>>, %arg4: memref<1x8xf32, #tpu.memory_space<vmem>>, %arg5: memref<8x12xf32, #tpu.memory_space<vmem>>, %arg6: memref<2x12xf32, #tpu.memory_space<vmem>>, %arg7: memref<12x8xf32, #tpu.memory_space<vmem>>, %arg8: memref<1x8xf32, #tpu.memory_space<vmem>>, %arg9: memref<8x12xf32, #tpu.memory_space<vmem>>, %arg10: memref<2x16xf32, #tpu.memory_space<vmem>>, %arg11: memref<16x8xf32, #tpu.memory_space<vmem>>, %arg12: memref<1x8xf32, #tpu.memory_space<vmem>>, %arg13: memref<8x12xf32, #tpu.memory_space<vmem>>, %arg14: memref<1x16x20xf32, #tpu.memory_space<vmem>>) attributes {dimension_semantics = [#tpu.dimension_semantics<parallel>], iteration_bounds = array<i64: 2>, scalar_prefetch = 0 : i64, scratch_operands = 0 : i64, tpu.core_type = #tpu.core_type<tc>, window_params = [{transform_indices = @transform_0, window_bounds = array<i64: 1, 16, 8>}, {pipeline_mode = #tpu.pipeline_mode<synchronous>, transform_indices = @transform_1, window_bounds = array<i64: 2, 8>}, {pipeline_mode = #tpu.pipeline_mode<synchronous>, transform_indices = @transform_2, window_bounds = array<i64: 8, 8>}, {pipeline_mode = #tpu.pipeline_mode<synchronous>, transform_indices = @transform_3, window_bounds = array<i64: 1, 8>}, {pipeline_mode = #tpu.pipeline_mode<synchronous>, transform_indices = @transform_4, window_bounds = array<i64: 8, 12>}, {pipeline_mode = #tpu.pipeline_mode<synchronous>, transform_indices = @transform_5, window_bounds = array<i64: 2, 12>}, {pipeline_mode = #tpu.pipeline_mode<synchronous>, transform_indices = @transform_6, window_bounds = array<i64: 12, 8>}, {pipeline_mode = #tpu.pipeline_mode<synchronous>, transform_indices = @transform_7, window_bounds = array<i64: 1, 8>}, {pipeline_mode = #tpu.pipeline_mode<synchronous>, transform_indices = @transform_8, window_bounds = array<i64: 8, 12>}, {pipeline_mode = #tpu.pipeline_mode<synchronous>, transform_indices = @transform_9, window_bounds = array<i64: 2, 16>}, {pipeline_mode = #tpu.pipeline_mode<synchronous>, transform_indices = @transform_10, window_bounds = array<i64: 16, 8>}, {pipeline_mode = #tpu.pipeline_mode<synchronous>, transform_indices = @transform_11, window_bounds = array<i64: 1, 8>}, {pipeline_mode = #tpu.pipeline_mode<synchronous>, transform_indices = @transform_12, window_bounds = array<i64: 8, 12>}, {transform_indices = @transform_13, window_bounds = array<i64: 1, 16, 20>}]} {
    %c0 = arith.constant 0 : index
    %c0_0 = arith.constant 0 : index
    %c0_1 = arith.constant 0 : index
    %0 = vector.load %arg1[%c0, %c0_0, %c0_1] : memref<1x16x8xf32, #tpu.memory_space<vmem>>, vector<1x16x8xf32>
    %1 = vector.shape_cast %0 : vector<1x16x8xf32> to vector<16x8xf32>
    %c0_2 = arith.constant 0 : index
    %c0_3 = arith.constant 0 : index
    %c0_4 = arith.constant 0 : index
    %2 = vector.load %arg14[%c0_2, %c0_3, %c0_4] : memref<1x16x20xf32, #tpu.memory_space<vmem>>, vector<1x16x8xf32>
    %3 = vector.shape_cast %2 : vector<1x16x8xf32> to vector<16x8xf32>
    %4 = vector.shape_cast %1 : vector<16x8xf32> to vector<1x16x8xf32>
    tpu.vector_store %arg14[%c0_2, %c0_3, %c0_4], %4 {strides = array<i32>} : memref<1x16x20xf32, #tpu.memory_space<vmem>>, vector<1x16x8xf32>,
    %5 = tpu.iota {dimensions = array<i32: 0>} : vector<16x4xi32>
    %c1_i32 = arith.constant 1 : i32
    %6 = vector.broadcast %c1_i32 : i32 to vector<16x4xi32>
    %7 = arith.cmpi sge, %5, %6 : vector<16x4xi32>
    %c14_i32 = arith.constant 14 : i32
    %8 = vector.broadcast %c14_i32 : i32 to vector<16x4xi32>
    %9 = arith.cmpi sle, %5, %8 : vector<16x4xi32>
    %c0_5 = arith.constant 0 : index
    %c0_6 = arith.constant 0 : index
    %c0_7 = arith.constant 0 : index
    %10 = vector.load %arg14[%c0_5, %c0_6, %c0_7] : memref<1x16x20xf32, #tpu.memory_space<vmem>>, vector<1x16x8xf32>
    %11 = vector.shape_cast %10 : vector<1x16x8xf32> to vector<16x8xf32>
    %c0_8 = arith.constant 0 : index
    %c0_9 = arith.constant 0 : index
    %12 = vector.load %arg2[%c0_8, %c0_9] : memref<2x8xf32, #tpu.memory_space<vmem>>, vector<2x8xf32>
    %13 = vector.extract_strided_slice %12 {offsets = [0, 0], sizes = [1, 8], strides = [1, 1]} : vector<2x8xf32> to vector<1x8xf32>
    %14 = vector.broadcast %13 : vector<1x8xf32> to vector<16x8xf32>
    %15 = arith.mulf %11, %14 : vector<16x8xf32>
    %16 = vector.extract_strided_slice %12 {offsets = [1, 0], sizes = [1, 8], strides = [1, 1]} : vector<2x8xf32> to vector<1x8xf32>
    %17 = vector.broadcast %16 : vector<1x8xf32> to vector<16x8xf32>
    %18 = arith.addf %15, %17 : vector<16x8xf32>
    %cst = arith.constant 0.000000e+00 : f32
    %19 = vector.broadcast %cst : f32 to vector<16x8xf32>
    %20 = arith.maximumf %18, %19 : vector<16x8xf32>
    %c0_10 = arith.constant 0 : index
    %c0_11 = arith.constant 0 : index
    %21 = vector.load %arg3[%c0_10, %c0_11] : memref<8x8xf32, #tpu.memory_space<vmem>>, vector<8x8xf32>
    %cst_12 = arith.constant dense<0.000000e+00> : vector<16x8xf32>
    %22 = tpu.matmul %20, %21, %cst_12 {dimension_numbers = #tpu.dot_dimension_numbers<[1], [0], [0], [1], [0, 0, 1, 1], [], []>} : vector<16x8xf32>, vector<8x8xf32>, vector<16x8xf32> -> vector<16x8xf32>
    %c0_13 = arith.constant 0 : index
    %c0_14 = arith.constant 0 : index
    %23 = vector.load %arg4[%c0_13, %c0_14] : memref<1x8xf32, #tpu.memory_space<vmem>>, vector<1x8xf32>
    %24 = vector.broadcast %23 : vector<1x8xf32> to vector<16x8xf32>
    %25 = arith.addf %22, %24 : vector<16x8xf32>
    %cst_15 = arith.constant 0.000000e+00 : f32
    %26 = vector.broadcast %cst_15 : f32 to vector<16x8xf32>
    %27 = arith.maximumf %25, %26 : vector<16x8xf32>
    %c0_16 = arith.constant 0 : index
    %c0_17 = arith.constant 0 : index
    %28 = vector.load %arg5[%c0_16, %c0_17] : memref<8x12xf32, #tpu.memory_space<vmem>>, vector<8x12xf32>
    %cst_18 = arith.constant dense<0.000000e+00> : vector<16x12xf32>
    %29 = tpu.matmul %27, %28, %cst_18 {dimension_numbers = #tpu.dot_dimension_numbers<[1], [0], [0], [1], [0, 0, 1, 1], [], []>} : vector<16x8xf32>, vector<8x12xf32>, vector<16x12xf32> -> vector<16x12xf32>
    %30 = vector.extract_strided_slice %29 {offsets = [0, 4], sizes = [16, 4], strides = [1, 1]} : vector<16x12xf32> to vector<16x4xf32>
    %31 = vector.extract_strided_slice %29 {offsets = [0, 0], sizes = [16, 4], strides = [1, 1]} : vector<16x12xf32> to vector<16x4xf32>
    %c1_i32_19 = arith.constant 1 : i32
    %32 = tpu.dynamic_rotate %31 by %c1_i32_19 dim 0 : vector<16x4xf32>, i32 -> vector<16x4xf32>
    %cst_20 = arith.constant 0.000000e+00 : f32
    %33 = vector.broadcast %cst_20 : f32 to vector<16x4xf32>
    %34 = arith.select %7, %32, %33 : vector<16x4xi1>, vector<16x4xf32>
    %35 = arith.addf %30, %34 : vector<16x4xf32>
    %36 = vector.extract_strided_slice %29 {offsets = [0, 8], sizes = [16, 4], strides = [1, 1]} : vector<16x12xf32> to vector<16x4xf32>
    %c15_i32 = arith.constant 15 : i32
    %37 = tpu.dynamic_rotate %36 by %c15_i32 dim 0 : vector<16x4xf32>, i32 -> vector<16x4xf32>
    %cst_21 = arith.constant 0.000000e+00 : f32
    %38 = vector.broadcast %cst_21 : f32 to vector<16x4xf32>
    %39 = arith.select %9, %37, %38 : vector<16x4xi1>, vector<16x4xf32>
    %40 = arith.addf %35, %39 : vector<16x4xf32>
    %c0_22 = arith.constant 0 : index
    %c0_23 = arith.constant 0 : index
    %c8 = arith.constant 8 : index
    %41 = vector.load %arg14[%c0_22, %c0_23, %c8] : memref<1x16x20xf32, #tpu.memory_space<vmem>>, vector<1x16x4xf32>
    %42 = vector.shape_cast %41 : vector<1x16x4xf32> to vector<16x4xf32>
    %43 = vector.shape_cast %40 : vector<16x4xf32> to vector<1x16x4xf32>
    tpu.vector_store %arg14[%c0_22, %c0_23, %c8], %43 {strides = array<i32>} : memref<1x16x20xf32, #tpu.memory_space<vmem>>, vector<1x16x4xf32>,
    %c0_24 = arith.constant 0 : index
    %c0_25 = arith.constant 0 : index
    %c0_26 = arith.constant 0 : index
    %44 = vector.load %arg14[%c0_24, %c0_25, %c0_26] : memref<1x16x20xf32, #tpu.memory_space<vmem>>, vector<1x16x12xf32>
    %45 = vector.shape_cast %44 : vector<1x16x12xf32> to vector<16x12xf32>
    %c0_27 = arith.constant 0 : index
    %c0_28 = arith.constant 0 : index
    %46 = vector.load %arg6[%c0_27, %c0_28] : memref<2x12xf32, #tpu.memory_space<vmem>>, vector<2x12xf32>
    %47 = vector.extract_strided_slice %46 {offsets = [0, 0], sizes = [1, 12], strides = [1, 1]} : vector<2x12xf32> to vector<1x12xf32>
    %48 = vector.broadcast %47 : vector<1x12xf32> to vector<16x12xf32>
    %49 = arith.mulf %45, %48 : vector<16x12xf32>
    %50 = vector.extract_strided_slice %46 {offsets = [1, 0], sizes = [1, 12], strides = [1, 1]} : vector<2x12xf32> to vector<1x12xf32>
    %51 = vector.broadcast %50 : vector<1x12xf32> to vector<16x12xf32>
    %52 = arith.addf %49, %51 : vector<16x12xf32>
    %cst_29 = arith.constant 0.000000e+00 : f32
    %53 = vector.broadcast %cst_29 : f32 to vector<16x12xf32>
    %54 = arith.maximumf %52, %53 : vector<16x12xf32>
    %c0_30 = arith.constant 0 : index
    %c0_31 = arith.constant 0 : index
    %55 = vector.load %arg7[%c0_30, %c0_31] : memref<12x8xf32, #tpu.memory_space<vmem>>, vector<12x8xf32>
    %cst_32 = arith.constant dense<0.000000e+00> : vector<16x8xf32>
    %56 = tpu.matmul %54, %55, %cst_32 {dimension_numbers = #tpu.dot_dimension_numbers<[1], [0], [0], [1], [0, 0, 1, 1], [], []>} : vector<16x12xf32>, vector<12x8xf32>, vector<16x8xf32> -> vector<16x8xf32>
    %c0_33 = arith.constant 0 : index
    %c0_34 = arith.constant 0 : index
    %57 = vector.load %arg8[%c0_33, %c0_34] : memref<1x8xf32, #tpu.memory_space<vmem>>, vector<1x8xf32>
    %58 = vector.broadcast %57 : vector<1x8xf32> to vector<16x8xf32>
    %59 = arith.addf %56, %58 : vector<16x8xf32>
    %cst_35 = arith.constant 0.000000e+00 : f32
    %60 = vector.broadcast %cst_35 : f32 to vector<16x8xf32>
    %61 = arith.maximumf %59, %60 : vector<16x8xf32>
    %c0_36 = arith.constant 0 : index
    %c0_37 = arith.constant 0 : index
    %62 = vector.load %arg9[%c0_36, %c0_37] : memref<8x12xf32, #tpu.memory_space<vmem>>, vector<8x12xf32>
    %cst_38 = arith.constant dense<0.000000e+00> : vector<16x12xf32>
    %63 = tpu.matmul %61, %62, %cst_38 {dimension_numbers = #tpu.dot_dimension_numbers<[1], [0], [0], [1], [0, 0, 1, 1], [], []>} : vector<16x8xf32>, vector<8x12xf32>, vector<16x12xf32> -> vector<16x12xf32>
    %64 = vector.extract_strided_slice %63 {offsets = [0, 4], sizes = [16, 4], strides = [1, 1]} : vector<16x12xf32> to vector<16x4xf32>
    %65 = vector.extract_strided_slice %63 {offsets = [0, 0], sizes = [16, 4], strides = [1, 1]} : vector<16x12xf32> to vector<16x4xf32>
    %c1_i32_39 = arith.constant 1 : i32
    %66 = tpu.dynamic_rotate %65 by %c1_i32_39 dim 0 : vector<16x4xf32>, i32 -> vector<16x4xf32>
    %cst_40 = arith.constant 0.000000e+00 : f32
    %67 = vector.broadcast %cst_40 : f32 to vector<16x4xf32>
    %68 = arith.select %7, %66, %67 : vector<16x4xi1>, vector<16x4xf32>
    %69 = arith.addf %64, %68 : vector<16x4xf32>
    %70 = vector.extract_strided_slice %63 {offsets = [0, 8], sizes = [16, 4], strides = [1, 1]} : vector<16x12xf32> to vector<16x4xf32>
    %c15_i32_41 = arith.constant 15 : i32
    %71 = tpu.dynamic_rotate %70 by %c15_i32_41 dim 0 : vector<16x4xf32>, i32 -> vector<16x4xf32>
    %cst_42 = arith.constant 0.000000e+00 : f32
    %72 = vector.broadcast %cst_42 : f32 to vector<16x4xf32>
    %73 = arith.select %9, %71, %72 : vector<16x4xi1>, vector<16x4xf32>
    %74 = arith.addf %69, %73 : vector<16x4xf32>
    %c0_43 = arith.constant 0 : index
    %c0_44 = arith.constant 0 : index
    %c12 = arith.constant 12 : index
    %75 = vector.load %arg14[%c0_43, %c0_44, %c12] : memref<1x16x20xf32, #tpu.memory_space<vmem>>, vector<1x16x4xf32>
    %76 = vector.shape_cast %75 : vector<1x16x4xf32> to vector<16x4xf32>
    %77 = vector.shape_cast %74 : vector<16x4xf32> to vector<1x16x4xf32>
    tpu.vector_store %arg14[%c0_43, %c0_44, %c12], %77 {strides = array<i32>} : memref<1x16x20xf32, #tpu.memory_space<vmem>>, vector<1x16x4xf32>,
    %c0_45 = arith.constant 0 : index
    %c0_46 = arith.constant 0 : index
    %c0_47 = arith.constant 0 : index
    %78 = vector.load %arg14[%c0_45, %c0_46, %c0_47] : memref<1x16x20xf32, #tpu.memory_space<vmem>>, vector<1x16x16xf32>
    %79 = vector.shape_cast %78 : vector<1x16x16xf32> to vector<16x16xf32>
    %c0_48 = arith.constant 0 : index
    %c0_49 = arith.constant 0 : index
    %80 = vector.load %arg10[%c0_48, %c0_49] : memref<2x16xf32, #tpu.memory_space<vmem>>, vector<2x16xf32>
    %81 = vector.extract_strided_slice %80 {offsets = [0, 0], sizes = [1, 16], strides = [1, 1]} : vector<2x16xf32> to vector<1x16xf32>
    %82 = vector.broadcast %81 : vector<1x16xf32> to vector<16x16xf32>
    %83 = arith.mulf %79, %82 : vector<16x16xf32>
    %84 = vector.extract_strided_slice %80 {offsets = [1, 0], sizes = [1, 16], strides = [1, 1]} : vector<2x16xf32> to vector<1x16xf32>
    %85 = vector.broadcast %84 : vector<1x16xf32> to vector<16x16xf32>
    %86 = arith.addf %83, %85 : vector<16x16xf32>
    %cst_50 = arith.constant 0.000000e+00 : f32
    %87 = vector.broadcast %cst_50 : f32 to vector<16x16xf32>
    %88 = arith.maximumf %86, %87 : vector<16x16xf32>
    %c0_51 = arith.constant 0 : index
    %c0_52 = arith.constant 0 : index
    %89 = vector.load %arg11[%c0_51, %c0_52] : memref<16x8xf32, #tpu.memory_space<vmem>>, vector<16x8xf32>
    %cst_53 = arith.constant dense<0.000000e+00> : vector<16x8xf32>
    %90 = tpu.matmul %88, %89, %cst_53 {dimension_numbers = #tpu.dot_dimension_numbers<[1], [0], [0], [1], [0, 0, 1, 1], [], []>} : vector<16x16xf32>, vector<16x8xf32>, vector<16x8xf32> -> vector<16x8xf32>
    %c0_54 = arith.constant 0 : index
    %c0_55 = arith.constant 0 : index
    %91 = vector.load %arg12[%c0_54, %c0_55] : memref<1x8xf32, #tpu.memory_space<vmem>>, vector<1x8xf32>
    %92 = vector.broadcast %91 : vector<1x8xf32> to vector<16x8xf32>
    %93 = arith.addf %90, %92 : vector<16x8xf32>
    %cst_56 = arith.constant 0.000000e+00 : f32
    %94 = vector.broadcast %cst_56 : f32 to vector<16x8xf32>
    %95 = arith.maximumf %93, %94 : vector<16x8xf32>
    %c0_57 = arith.constant 0 : index
    %c0_58 = arith.constant 0 : index
    %96 = vector.load %arg13[%c0_57, %c0_58] : memref<8x12xf32, #tpu.memory_space<vmem>>, vector<8x12xf32>
    %cst_59 = arith.constant dense<0.000000e+00> : vector<16x12xf32>
    %97 = tpu.matmul %95, %96, %cst_59 {dimension_numbers = #tpu.dot_dimension_numbers<[1], [0], [0], [1], [0, 0, 1, 1], [], []>} : vector<16x8xf32>, vector<8x12xf32>, vector<16x12xf32> -> vector<16x12xf32>
    %98 = vector.extract_strided_slice %97 {offsets = [0, 4], sizes = [16, 4], strides = [1, 1]} : vector<16x12xf32> to vector<16x4xf32>
    %99 = vector.extract_strided_slice %97 {offsets = [0, 0], sizes = [16, 4], strides = [1, 1]} : vector<16x12xf32> to vector<16x4xf32>
    %c1_i32_60 = arith.constant 1 : i32
    %100 = tpu.dynamic_rotate %99 by %c1_i32_60 dim 0 : vector<16x4xf32>, i32 -> vector<16x4xf32>
    %cst_61 = arith.constant 0.000000e+00 : f32
    %101 = vector.broadcast %cst_61 : f32 to vector<16x4xf32>
    %102 = arith.select %7, %100, %101 : vector<16x4xi1>, vector<16x4xf32>
    %103 = arith.addf %98, %102 : vector<16x4xf32>
    %104 = vector.extract_strided_slice %97 {offsets = [0, 8], sizes = [16, 4], strides = [1, 1]} : vector<16x12xf32> to vector<16x4xf32>
    %c15_i32_62 = arith.constant 15 : i32
    %105 = tpu.dynamic_rotate %104 by %c15_i32_62 dim 0 : vector<16x4xf32>, i32 -> vector<16x4xf32>
    %cst_63 = arith.constant 0.000000e+00 : f32
    %106 = vector.broadcast %cst_63 : f32 to vector<16x4xf32>
    %107 = arith.select %9, %105, %106 : vector<16x4xi1>, vector<16x4xf32>
    %108 = arith.addf %103, %107 : vector<16x4xf32>
    %c0_64 = arith.constant 0 : index
    %c0_65 = arith.constant 0 : index
    %c16 = arith.constant 16 : index
    %109 = vector.load %arg14[%c0_64, %c0_65, %c16] : memref<1x16x20xf32, #tpu.memory_space<vmem>>, vector<1x16x4xf32>
    %110 = vector.shape_cast %109 : vector<1x16x4xf32> to vector<16x4xf32>
    %111 = vector.shape_cast %108 : vector<16x4xf32> to vector<1x16x4xf32>
    tpu.vector_store %arg14[%c0_64, %c0_65, %c16], %111 {strides = array<i32>} : memref<1x16x20xf32, #tpu.memory_space<vmem>>, vector<1x16x4xf32>,
    return
  }
  func.func @transform_0(%arg0: i32) -> (i32, i32, i32) {
    %c0_i32 = arith.constant 0 : i32
    %c0_i32_0 = arith.constant 0 : i32
    %c0_i32_1 = arith.constant 0 : i32
    return %arg0, %c0_i32, %c0_i32_0 : i32, i32, i32
  }
  func.func @transform_1(%arg0: i32) -> (i32, i32) {
    %c0_i32 = arith.constant 0 : i32
    %c0_i32_0 = arith.constant 0 : i32
    %c0_i32_1 = arith.constant 0 : i32
    return %c0_i32, %c0_i32_0 : i32, i32
  }
  func.func @transform_2(%arg0: i32) -> (i32, i32) {
    %c0_i32 = arith.constant 0 : i32
    %c0_i32_0 = arith.constant 0 : i32
    %c0_i32_1 = arith.constant 0 : i32
    return %c0_i32, %c0_i32_0 : i32, i32
  }
  func.func @transform_3(%arg0: i32) -> (i32, i32) {
    %c0_i32 = arith.constant 0 : i32
    %c0_i32_0 = arith.constant 0 : i32
    %c0_i32_1 = arith.constant 0 : i32
    return %c0_i32, %c0_i32_0 : i32, i32
  }
  func.func @transform_4(%arg0: i32) -> (i32, i32) {
    %c0_i32 = arith.constant 0 : i32
    %c0_i32_0 = arith.constant 0 : i32
    %c0_i32_1 = arith.constant 0 : i32
    return %c0_i32, %c0_i32_0 : i32, i32
  }
  func.func @transform_5(%arg0: i32) -> (i32, i32) {
    %c0_i32 = arith.constant 0 : i32
    %c0_i32_0 = arith.constant 0 : i32
    %c0_i32_1 = arith.constant 0 : i32
    return %c0_i32, %c0_i32_0 : i32, i32
  }
  func.func @transform_6(%arg0: i32) -> (i32, i32) {
    %c0_i32 = arith.constant 0 : i32
    %c0_i32_0 = arith.constant 0 : i32
    %c0_i32_1 = arith.constant 0 : i32
    return %c0_i32, %c0_i32_0 : i32, i32
  }
  func.func @transform_7(%arg0: i32) -> (i32, i32) {
    %c0_i32 = arith.constant 0 : i32
    %c0_i32_0 = arith.constant 0 : i32
    %c0_i32_1 = arith.constant 0 : i32
    return %c0_i32, %c0_i32_0 : i32, i32
  }
  func.func @transform_8(%arg0: i32) -> (i32, i32) {
    %c0_i32 = arith.constant 0 : i32
    %c0_i32_0 = arith.constant 0 : i32
    %c0_i32_1 = arith.constant 0 : i32
    return %c0_i32, %c0_i32_0 : i32, i32
  }
  func.func @transform_9(%arg0: i32) -> (i32, i32) {
    %c0_i32 = arith.constant 0 : i32
    %c0_i32_0 = arith.constant 0 : i32
    %c0_i32_1 = arith.constant 0 : i32
    return %c0_i32, %c0_i32_0 : i32, i32
  }
  func.func @transform_10(%arg0: i32) -> (i32, i32) {
    %c0_i32 = arith.constant 0 : i32
    %c0_i32_0 = arith.constant 0 : i32
    %c0_i32_1 = arith.constant 0 : i32
    return %c0_i32, %c0_i32_0 : i32, i32
  }
  func.func @transform_11(%arg0: i32) -> (i32, i32) {
    %c0_i32 = arith.constant 0 : i32
    %c0_i32_0 = arith.constant 0 : i32
    %c0_i32_1 = arith.constant 0 : i32
    return %c0_i32, %c0_i32_0 : i32, i32
  }
  func.func @transform_12(%arg0: i32) -> (i32, i32) {
    %c0_i32 = arith.constant 0 : i32
    %c0_i32_0 = arith.constant 0 : i32
    %c0_i32_1 = arith.constant 0 : i32
    return %c0_i32, %c0_i32_0 : i32, i32
  }
  func.func @transform_13(%arg0: i32) -> (i32, i32, i32) {
    %c0_i32 = arith.constant 0 : i32
    %c0_i32_0 = arith.constant 0 : i32
    %c0_i32_1 = arith.constant 0 : i32
    return %arg0, %c0_i32, %c0_i32_0 : i32, i32, i32
  }
}

</mosaic_0001>

<bundles_post_ra>
// kernel: tpu_custom_call.1
= control target key start
LH: loop header
LB: loop body
LE: loop exit
PB: predicated region body
PF: predicated region fallthrough
CT: control target
= control target key end

     0   :  { %s1796_s0 = inlined_call_operand.vmem [shape: f32[2,16,8], index: 0, kind: input, shape index: {}]   ;;  %s1797_s1 = inlined_call_operand.vmem [shape: f32[2,8], index: 1, kind: input, shape index: {}]   ;;  %s1798_s2 = inlined_call_operand.vmem [shape: f32[8,8], index: 2, kind: input, shape index: {}]   ;;  %s1799_s3 = inlined_call_operand.vmem [shape: f32[1,8], index: 3, kind: input, shape index: {}]   ;;  %s1800_s4 = inlined_call_operand.vmem [shape: f32[8,12], index: 4, kind: input, shape index: {}]   ;;  %s1801_s5 = inlined_call_operand.vmem [shape: f32[2,12], index: 5, kind: input, shape index: {}]   ;;  %s1802_s6 = inlined_call_operand.vmem [shape: f32[12,8], index: 6, kind: input, shape index: {}]   ;;  %s1803_s7 = inlined_call_operand.vmem [shape: f32[1,8], index: 7, kind: input, shape index: {}]   ;;  %s1804_s8 = inlined_call_operand.vmem [shape: f32[8,12], index: 8, kind: input, shape index: {}]   ;;  %s1805_s9 = inlined_call_operand.vmem [shape: f32[2,16], index: 9, kind: input, shape index: {}]   ;;  %s1806_s10 = inlined_call_operand.vmem [shape: f32[16,8], index: 10, kind: input, shape index: {}]   ;;  %s1807_s11 = inlined_call_operand.vmem [shape: f32[1,8], index: 11, kind: input, shape index: {}]   ;;  %s1808_s12 = inlined_call_operand.vmem [shape: f32[8,12], index: 12, kind: input, shape index: {}]   ;;  %s1809_s13 = inlined_call_operand.hbm [shape: f32[2,16,20], index: 13, kind: output, shape index: {}]  }
   0x1   :  { %1812 = sst [smem:[#allocation5_spill]] %s1796_s0 }
   0x2   :  { %1813 = sst [smem:[#allocation6_spill]] %s1797_s1 }
   0x3   :  { %18 = vsyncpa [#allocation3], 0 }
   0x4   :  { %20 = vsyncpa [#allocation3 + $0x1], 0  ;;  %s1540_s25 = smov 0   ;;  %s1542_s26 = smov 0  }
   0x5   :  { %s1544_s27 = smov 0   ;;  %s1546_s28 = smov 0  }
   0x6 LB: > { %s1561_s29 = sadd.s32 4294967295, %s1461_s28   ;;  %s1260_s30 = sadd.s32 4294967294, %s1461_s28   ;;  %s1461_s28 = sphi %s1546_s28, %s1823_s28   ;;  %s1457_s27 = sphi %s1544_s27, %s1822_s27   ;;  %s1453_s26 = sphi %s1542_s26, %s1821_s26   ;;  %s1449_s25 = sphi %s1540_s25, %s1820_s25  }
   0x7   : > { %s1565_s14 = sadd.s32 1, %s1461_s28   ;;  %s311_s15 = sadd.s32 1, %s1457_s27 }
   0x8   : > { %s308_s16 = ssub.s32 %s1461_s28, %s1565_s14  ;;  %p321_p0 = scmp.ne.s32.totalorder %s1457_s27, %s1453_s26 }
   0x9   : > { %p309_p1 = scmp.eq.s32.totalorder %s308_s16, 0  ;;  %p322_p2 = scmp.eq.s32.totalorder %s1561_s29, 1 }
   0xa   : > { %p327_p3 = scmp.ne.s32.totalorder %s1453_s26, %s1449_s25  ;;  %p328_p4 = scmp.eq.s32.totalorder %s1260_s30, 1 }
   0xb   : > { %s1576_s17 = scalar_select %p309_p1, %s1457_s27, %s311_s15  }
   0xc   : > { %p1578_p5 = por %p322_p2, %p321_p0  ;;  %p1582_p6 = por %p328_p4, %p327_p3 }
   0xd   : > { %p1263_p7 = scmp.ge.s32.totalorder %s1461_s28, 1  ;;  %p390_p8 = scmp.lt.s32.totalorder %s1461_s28, 3 }
   0xf   : > { %p391_p9 = pnand %p1263_p7, %p390_p8 }
  0x10   : > { %v468_v0 = vld [vmem:[%s1798_s2] sm:$0xff] (!%p391_p9)  ;;  %s1810_s22 = sand.u32 (!%p391_p9), 1, %s1453_s26   ;;  %p434_p10 = scmp.lt.s32.totalorder (!%p391_p9), %s1561_s29, 1  ;;  %v444_v1 = vlaneseq (!%p391_p9)  ;;  %vm441_vm0 = vcmask (!%p391_p9), 64512   ;;  %v712_v43 = vld [vmem:[%s1802_s6 + $0x8] sm:$0xf] (!%p391_p9) }
  0x11   : > { %394 = sbr.rel (%p391_p9) target bundleno = 2437 (0x985), region = 72  ;;  %1310 = vmatprep.subr.mxu0 (!%p391_p9), %v468_v0  ;;  %s1264_s23 = sshll.u32 (!%p391_p9), %s1810_s22, 4  ;;  %v559_v18 = vld [vmem:[%s1800_s4] sm:$0xff] (!%p391_p9)  ;;  %vm727_vm5 = vcmask (!%p391_p9), 1043456   ;;  %vm1465_vm6 = vmmov (!%p391_p9), 1   ;;  %vm691_vm8 = vcmask (!%p391_p9), 97344  }
  0x12   : > { %1311 = vmatpush3.msra.mxu0 (!%p391_p9), %v468_v0  ;;  %v1596_v2 = vshrl.u32 (!%p391_p9), %v444_v1, 7  ;;  %s1816_s0 = sld [smem:[#allocation5_spill]] (!%p391_p9)  ;;  %s1601_s21 = scalar_lea.vmem (!%p391_p9), [#allocation2], %s1264_s23  ;;  %1315 = vmatprep.subr.mxu1 (!%p391_p9), %v559_v18  ;;  %v1267_v19 = vld [vmem:[%s1799_s3] ss:$0 sm:$0xff] (!%p391_p9)  ;;  %vm1345_vm7 = vmpackc.low (!%p391_p9), %vm727_vm5, %vm1465_vm6  ;;  %vm720_vm9 = vcmask (!%p391_p9), 97280  }
  0x13   : > { %s1817_s1 = sld [smem:[#allocation6_spill]] (!%p391_p9)  ;;  %1316 = vmatpush3.msra.mxu1 (!%p391_p9), %v559_v18  ;;  %s1463_s16 = smov (!%p391_p9), 120   ;;  %v711_v42 = vld [vmem:[%s1802_s6] sm:$0xff] (!%p391_p9)  ;;  %vm938_vm10 = vcmask (!%p391_p9), 130144   ;;  %vm967_vm11 = vcmask (!%p391_p9), 130048   ;;  %vm1181_vm12 = vcmask (!%p391_p9), 162944  }
  0x14   : > { %v1608_v5 = vsub.s32 (!%p391_p9), 0, %v1596_v2  ;;  %v1614_v7 = vsub.s32 (!%p391_p9), 1, %v1596_v2  ;;  %vm643_vm1 = vcmp.lt.s32.totalorder (!%p391_p9), %v1596_v2, 1  ;;  %vm447_vm2 = vcmp.ge.s32.totalorder (!%p391_p9), %v1596_v2, 1  ;;  %v696_v54 = vld [vmem:[%s1801_s5] sm:$0x3] (!%p391_p9) }
  0x15   : > { %v1643_v34 = vadd.s32 (!%p391_p9), 8, %v1596_v2  ;;  %vm668_vm3 = vcmp.lt.s32.totalorder (!%p391_p9), %v1596_v2, 7  ;;  %v1344_v44 = vpack.c.bf16 (!%p391_p9), %v712_v43, %v711_v42  ;;  %v808_v1 = vld [vmem:[%s1804_s8] sm:$0xff] (!%p391_p9)  ;;  %s1811_s15 = smov (!%p391_p9), 8   ;;  %s1289_s23 = sshll.u32 (!%p391_p9), %s1561_s29, 8 }
  0x16   : > { %v700_v55 = vrot.slane (!%p391_p9), %v696_v54, %v1608_v5  ;;  %v706_v56 = vrot.slane (!%p391_p9), %v696_v54, %v1614_v7  ;;  %1327 = vmatprep.subr.mxu1 (!%p391_p9), %v808_v1  ;;  %s1746_s22 = scalar_lea.hbm (!%p391_p9), %s1809_s13, %s1289_s23 }
  0x17   : > { %vm450_vm4 = vcmp.le.s32.totalorder (!%p391_p9), %v1643_v34, 14  ;;  %1346 = vmatprep.subr.msk.bf16.mxu0 (!%p391_p9), %vm1345_vm7, %v1344_v44 }
  0x18   : > { %s435_s24 = scalar_select %p434_p10, %s1561_s29, 1 }
  0x19   : > { %v453_v6 = vld [vmem:[%s1817_s1] sm:$0x3] }
  0x1a   : > { %s1288_s30 = sshll.u32 %s435_s24, 4  ;;  %v457_v8 = vrot.slane %v453_v6, %v1608_v5  ;;  %v463_v9 = vrot.slane %v453_v6, %v1614_v7 }
  0x1b   : > { %s438_s20 = scalar_lea.vmem %s1816_s0, %s1288_s30  ;;  %s1198_s30 = sshll.u32 %s1601_s21, 4  ;;  %s1748_s30 = int_to_ptr.vmem [resolvable:$true] %s1198_s30 }
  0x1c   : > { %v439_v3 = vld [vmem:[%s438_s20] sm:$0xff]  ;;  %v440_v4 = vld [vmem:[%s438_s20 + $0x8] sm:$0xff]  ;;  %s1464_s20 = smov 4   ;;  %s1399_s29 = scalar_lea.vmem %s1748_s30, 256 }
  0x1d   : > { %442 = vst.msk [vmem:[%s1601_s21] sm:$0xff] %vm441_vm0, %v439_v3  ;;  %443 = vst.msk [vmem:[%s1601_s21 + $0x8] sm:$0xff] %vm441_vm0, %v440_v4  ;;  %v1272_v3 = vld [vmem:[%s1803_s7] ss:$0 sm:$0xff]  ;;  %p1400_p11 = scmp.ne.s32.totalorder %s1748_s30, %s1399_s29 }
  0x1f   : > { %p1401_p12 = pnand %p1400_p11, %p1578_p5 }
  0x21   : > { %p1402_p13 = pneg %p1401_p12 }
  0x24   : > { %v451_v10 = vld [vmem:[%s1601_s21] sm:$0xff]  ;;  %v452_v11 = vld [vmem:[%s1601_s21 + $0x8] sm:$0xff] }
  0x25   : > { %v458_v12 = vmul.f32 %v457_v8, %v451_v10  ;;  %v459_v13 = vmul.f32 %v457_v8, %v452_v11 }
  0x27   : > { %v464_v14 = vadd.f32 %v463_v9, %v458_v12  ;;  %v465_v15 = vadd.f32 %v463_v9, %v459_v13 }
  0x29   : > { %v466_v16 = vmax.f32 %v464_v14, 0.0  ;;  %v467_v17 = vmax.f32 %v465_v15, 0.0 }
  0x2b   : > { %1312 = vmatprep.mubr.msk.f32.mxu0 %vm441_vm0, %v466_v16 }
  0x2c   : > { %1313 = vmatmul.mubr.msk.f32.vlgmr.msra.gmra.mrb[0].mxu0 %vm441_vm0, %v467_v17 }
  0x2d   : > { %1349 = vmatpush3.bf16.msk.msra.mxu0 %vm1345_vm7, %v1344_v44 }
  0xff   : > { %v1314_v20 = vpop.f32.mrb[0].mxu0 }
 0x100   : > { %v554_v21 = vadd.f32 %v1314_v20, %v1267_v19  ;;  %v548_v22 = vpop.f32.mrb[1].mxu0 }
 0x101   : > { %v549_v23 = vadd.f32 %v1267_v19, %v548_v22 }
 0x102   : > { %v558_v25 = vmax.f32 %v554_v21, 0.0 }
 0x103   : > { %v557_v24 = vmax.f32 %v549_v23, 0.0 }
 0x105   : > { %1317 = vmatprep.mubr.msk.f32.mxu1 %vm441_vm0, %v557_v24 }
 0x106   : > { %1318 = vmatmul.mubr.msk.f32.vlgmr.msra.gmra.mrb[0].mxu1 %vm441_vm0, %v558_v25 }
 0x107   : > { %1328 = vmatpush3.msra.mxu1 %v808_v1 }
 0x1d9   : > { %v1319_v26 = vpop.f32.mrb[0].mxu1 }
 0x1da   : > { %v642_v27 = vrot.slane %v1319_v26, 7  ;;  %v632_v28 = vpop.f32.mrb[1].mxu1 }
 0x1db   : > { %v641_v29 = vrot.slane %v632_v28, 7  ;;  %660 = vrot.lane.b32.xlu0 %v632_v28, %s1463_s16 }
 0x1dd   : > { %v644_v30 = vsel %vm643_vm1, %v641_v29, %v642_v27  ;;  %v645_v31 = vsel %vm643_vm1, %v642_v27, %v641_v29  ;;  %v959_v27 = vld [vmem:[%s1806_s10 + $0x8] sm:$0xff] }
 0x1de   : > { %652 = vrot.lane.b32.xlu1 %v644_v30, %s1464_s20  ;;  %v646_v32 = vsel %vm447_vm2, %v645_v31, 0.0 }
 0x1df   : > { %662 = vrot.lane.b32.xlu0 %v1319_v26, %s1463_s16 }
 0x1e2   : > { %650 = vrot.lane.b32.xlu1 %v646_v32, %s1464_s20 }
 0x24d   : > { %v661_v33 = vpop.permute.xlu0 %660 }
 0x24e   : > { %v666_v36 = vrot.slane %v661_v33, 1 }
 0x250   : > { %v653_v41 = vpop.permute.xlu1 %652 }
 0x251   : > { %v663_v35 = vpop.permute.xlu0 %662  ;;  %v657_v47 = vadd.f32 %v1319_v26, %v653_v41  ;;  %v958_v26 = vld [vmem:[%s1806_s10] sm:$0xff] }
 0x252   : > { %v667_v37 = vrot.slane %v663_v35, 1 }
 0x254   : > { %v669_v38 = vsel %vm668_vm3, %v666_v36, %v667_v37  ;;  %v670_v39 = vsel %vm668_vm3, %v667_v37, %v666_v36  ;;  %v651_v45 = vpop.permute.xlu1 %650 }
 0x255   : > { %675 = vrot.lane.b32.xlu0 %v669_v38, %s1464_s20  ;;  %v672_v40 = vsel %vm450_vm4, %v670_v39, 0.0  ;;  %v656_v46 = vadd.f32 %v651_v45, %v632_v28  ;;  %v1350_v28 = vpack.c.bf16 %v959_v27, %v958_v26 }
 0x256   : > { %677 = vrot.lane.b32.xlu1 %v672_v40, %s1464_s20  ;;  %v943_v40 = vld [vmem:[%s1805_s9] sm:$0x3] }
 0x257   : > { %1351 = vmatprep.subr.bf16.mxu0 %v1350_v28  ;;  %v947_v41 = vrot.slane %v943_v40, %v1608_v5  ;;  %v953_v42 = vrot.slane %v943_v40, %v1614_v7  ;;  %v1278_v5 = vld [vmem:[%s1807_s11] ss:$0 sm:$0xff] }
 0x2c7   : > { %v676_v48 = vpop.permute.xlu0 %675 }
 0x2c8   : > { %v681_v49 = vadd.f32 %v676_v48, %v656_v46  ;;  %v678_v50 = vpop.permute.xlu1 %677 }
 0x2c9   : > { %v682_v51 = vadd.f32 %v678_v50, %v657_v47 }
 0x2ca   : > { %685 = vrot.lane.b32.xlu0 %v681_v49, %s1464_s20 }
 0x2cb   : > { %687 = vrot.lane.b32.xlu1 %v682_v51, %s1464_s20  ;;  %v1051_v51 = vld [vmem:[%s1808_s12] sm:$0xff] }
 0x2cc   : > { %1339 = vmatprep.subr.mxu1 %v1051_v51 }
 0x33c   : > { %v686_v52 = vpop.permute.xlu0 %685 }
 0x33d   : > { %692 = vst.msk [vmem:[%s1601_s21] sm:$0xff] %vm691_vm8, %v686_v52  ;;  %v688_v53 = vpop.permute.xlu1 %687 }
 0x33e   : > { %693 = vst.msk [vmem:[%s1601_s21 + $0x8] sm:$0xff] %vm691_vm8, %v688_v53 }
 0x344   : > { %v694_v57 = vld [vmem:[%s1601_s21] sm:$0xff] }
 0x345   : > { %v695_v58 = vld [vmem:[%s1601_s21 + $0x8] sm:$0xff]  ;;  %v701_v59 = vmul.f32 %v700_v55, %v694_v57 }
 0x346   : > { %v702_v60 = vmul.f32 %v700_v55, %v695_v58 }
 0x347   : > { %v707_v61 = vadd.f32 %v706_v56, %v701_v59 }
 0x348   : > { %v708_v62 = vadd.f32 %v706_v56, %v702_v60 }
 0x349   : > { %v709_v63 = vmax.f32 %v707_v61, 0.0 }
 0x34a   : > { %v710_v0 = vmax.f32 %v708_v62, 0.0 }
 0x34b   : > { %1324 = vmatprep.mubr.msk.f32.mxu0 %vm720_vm9, %v709_v63 }
 0x34c   : > { %1325 = vmatmul.mubr.msk.f32.vlgmr.msra.gmra.mrb[2].mxu0 %vm720_vm9, %v710_v0 }
 0x34d   : > { %1353 = vmatpush3.bf16.msra.mxu0 %v1350_v28 }
 0x41f   : > { %v1326_v4 = vpop.f32.mrb[2].mxu0 }
 0x420   : > { %v803_v6 = vadd.f32 %v1326_v4, %v1272_v3  ;;  %v797_v8 = vpop.f32.mrb[3].mxu0 }
 0x421   : > { %v798_v9 = vadd.f32 %v1272_v3, %v797_v8 }
 0x422   : > { %v807_v11 = vmax.f32 %v803_v6, 0.0 }
 0x423   : > { %v806_v10 = vmax.f32 %v798_v9, 0.0 }
 0x425   : > { %1329 = vmatprep.mubr.msk.f32.mxu1 %vm441_vm0, %v806_v10 }
 0x426   : > { %1330 = vmatmul.mubr.msk.f32.vlgmr.msra.gmra.mrb[2].mxu1 %vm441_vm0, %v807_v11 }
 0x427   : > { %1340 = vmatpush3.msra.mxu1 %v1051_v51 }
 0x4f9   : > { %v1331_v12 = vpop.f32.mrb[2].mxu1 }
 0x4fa   : > { %v891_v13 = vrot.slane %v1331_v12, 7  ;;  %910 = vrot.lane.b32.xlu1 %v1331_v12, %s1463_s16  ;;  %v881_v14 = vpop.f32.mrb[3].mxu1 }
 0x4fb   : > { %v890_v15 = vrot.slane %v881_v14, 7  ;;  %908 = vrot.lane.b32.xlu0 %v881_v14, %s1463_s16 }
 0x4fd   : > { %v892_v16 = vsel %vm643_vm1, %v890_v15, %v891_v13  ;;  %v893_v17 = vsel %vm643_vm1, %v891_v13, %v890_v15 }
 0x4fe   : > { %900 = vrot.lane.b32.xlu1 %v892_v16, %s1464_s20  ;;  %v894_v18 = vsel %vm447_vm2, %v893_v17, 0.0 }
 0x4ff   : > { %898 = vrot.lane.b32.xlu0 %v894_v18, %s1464_s20 }
 0x56c   : > { %v911_v19 = vpop.permute.xlu1 %910 }
 0x56d   : > { %v915_v20 = vrot.slane %v911_v19, 1  ;;  %v909_v21 = vpop.permute.xlu0 %908 }
 0x56e   : > { %v914_v22 = vrot.slane %v909_v21, 1 }
 0x570   : > { %v916_v23 = vsel %vm668_vm3, %v914_v22, %v915_v20  ;;  %v917_v24 = vsel %vm668_vm3, %v915_v20, %v914_v22  ;;  %v901_v30 = vpop.permute.xlu1 %900 }
 0x571   : > { %922 = vrot.lane.b32.xlu0 %v916_v23, %s1464_s20  ;;  %v919_v25 = vsel %vm450_vm4, %v917_v24, 0.0  ;;  %v899_v29 = vpop.permute.xlu0 %898  ;;  %v905_v32 = vadd.f32 %v1331_v12, %v901_v30 }
 0x572   : > { %924 = vrot.lane.b32.xlu1 %v919_v25, %s1464_s20  ;;  %v904_v31 = vadd.f32 %v899_v29, %v881_v14 }
 0x5e3   : > { %v923_v33 = vpop.permute.xlu0 %922 }
 0x5e4   : > { %v928_v35 = vadd.f32 %v923_v33, %v904_v31  ;;  %v925_v36 = vpop.permute.xlu1 %924 }
 0x5e5   : > { %v929_v37 = vadd.f32 %v925_v36, %v905_v32 }
 0x5e6   : > { %932 = vrot.lane.b32.xlu0 %v928_v35, %s1811_s15 }
 0x5e7   : > { %934 = vrot.lane.b32.xlu1 %v929_v37, %s1811_s15  ;;  %s1818_s15 = sand.u32 1, %s1453_s26  }
 0x5e8   : > { %s1754_s0 = scalar_lea.sflag [#allocation3], %s1818_s15 }
 0x658   : > { %v933_v38 = vpop.permute.xlu0 %932 }
 0x659   : > { %939 = vst.msk [vmem:[%s1601_s21] sm:$0xff] %vm938_vm10, %v933_v38  ;;  %v935_v39 = vpop.permute.xlu1 %934 }
 0x65a   : > { %940 = vst.msk [vmem:[%s1601_s21 + $0x8] sm:$0xff] %vm938_vm10, %v935_v39 }
 0x660   : > { %v941_v43 = vld [vmem:[%s1601_s21] sm:$0xff] }
 0x661   : > { %v942_v44 = vld [vmem:[%s1601_s21 + $0x8] sm:$0xff]  ;;  %v948_v45 = vmul.f32 %v947_v41, %v941_v43 }
 0x662   : > { %v949_v46 = vmul.f32 %v947_v41, %v942_v44 }
 0x663   : > { %v954_v47 = vadd.f32 %v953_v42, %v948_v45 }
 0x664   : > { %v955_v48 = vadd.f32 %v953_v42, %v949_v46 }
 0x665   : > { %v956_v49 = vmax.f32 %v954_v47, 0.0 }
 0x666   : > { %v957_v50 = vmax.f32 %v955_v48, 0.0 }
 0x667   : > { %1336 = vmatprep.mubr.msk.f32.mxu0 %vm967_vm11, %v956_v49 }
 0x668   : > { %1337 = vmatmul.mubr.msk.f32.vlgmr.msra.gmra.mrb[4].mxu0 %vm967_vm11, %v957_v50 }
 0x73b   : > { %v1338_v7 = vpop.f32.mrb[4].mxu0 }
 0x73c   : > { %v1046_v52 = vadd.f32 %v1338_v7, %v1278_v5  ;;  %v1040_v53 = vpop.f32.mrb[5].mxu0 }
 0x73d   : > { %v1041_v54 = vadd.f32 %v1278_v5, %v1040_v53 }
 0x73e   : > { %v1050_v56 = vmax.f32 %v1046_v52, 0.0 }
 0x73f   : > { %v1049_v55 = vmax.f32 %v1041_v54, 0.0 }
 0x741   : > { %1341 = vmatprep.mubr.msk.f32.mxu1 %vm441_vm0, %v1049_v55 }
 0x742   : > { %1342 = vmatmul.mubr.msk.f32.vlgmr.msra.gmra.mrb[4].mxu1 %vm441_vm0, %v1050_v56 }
 0x815   : > { %v1343_v57 = vpop.f32.mrb[4].mxu1 }
 0x816   : > { %v1134_v58 = vrot.slane %v1343_v57, 7  ;;  %1153 = vrot.lane.b32.xlu1 %v1343_v57, %s1463_s16  ;;  %v1124_v59 = vpop.f32.mrb[5].mxu1 }
 0x817   : > { %v1133_v60 = vrot.slane %v1124_v59, 7  ;;  %1151 = vrot.lane.b32.xlu0 %v1124_v59, %s1463_s16  ;;  %s1467_s16 = smov 12  }
 0x819   : > { %v1135_v61 = vsel %vm643_vm1, %v1133_v60, %v1134_v58  ;;  %v1136_v62 = vsel %vm643_vm1, %v1134_v58, %v1133_v60 }
 0x81a   : > { %1143 = vrot.lane.b32.xlu1 %v1135_v61, %s1464_s20  ;;  %v1137_v63 = vsel %vm447_vm2, %v1136_v62, 0.0 }
 0x81b   : > { %1141 = vrot.lane.b32.xlu0 %v1137_v63, %s1464_s20 }
 0x888   : > { %v1154_v0 = vpop.permute.xlu1 %1153 }
 0x889   : > { %v1158_v1 = vrot.slane %v1154_v0, 1  ;;  %v1152_v3 = vpop.permute.xlu0 %1151 }
 0x88a   : > { %v1157_v4 = vrot.slane %v1152_v3, 1 }
 0x88c   : > { %v1159_v6 = vsel %vm668_vm3, %v1157_v4, %v1158_v1  ;;  %v1160_v8 = vsel %vm668_vm3, %v1158_v1, %v1157_v4  ;;  %v1144_v11 = vpop.permute.xlu1 %1143 }
 0x88d   : > { %1165 = vrot.lane.b32.xlu0 %v1159_v6, %s1464_s20  ;;  %v1162_v9 = vsel %vm450_vm4, %v1160_v8, 0.0  ;;  %v1142_v10 = vpop.permute.xlu0 %1141  ;;  %v1148_v13 = vadd.f32 %v1343_v57, %v1144_v11 }
 0x88e   : > { %1167 = vrot.lane.b32.xlu1 %v1162_v9, %s1464_s20  ;;  %v1147_v12 = vadd.f32 %v1142_v10, %v1124_v59 }
 0x8ff   : > { %v1166_v14 = vpop.permute.xlu0 %1165 }
 0x900   : > { %v1171_v15 = vadd.f32 %v1166_v14, %v1147_v12  ;;  %v1168_v2 = vpop.permute.xlu1 %1167 }
 0x901   : > { %v1172_v16 = vadd.f32 %v1168_v2, %v1148_v13 }
 0x902   : > { %1175 = vrot.lane.b32.xlu0 %v1171_v15, %s1467_s16 }
 0x903   : > { %1177 = vrot.lane.b32.xlu1 %v1172_v16, %s1467_s16  ;;  %s1468_s16 = smov [#allocation2]  }
 0x904   : > { %s1403_s23 = sshll.u32 %s1468_s16, 4  ;;  %s1404_s23 = int_to_ptr.vmem [resolvable:$false] %s1403_s23 }
 0x905   : > { %s1405_s24 = scalar_lea.vmem %s1404_s23, 512  ;;  %p1406_p0 = scmp.lt.s32.totalorder %s1748_s30, %s1404_s23 }
 0x906   : > { %p1407_p1 = scmp.lt.s32.totalorder %s1405_s24, %s1399_s29 }
 0x908   : > { %p1408_p2 = por %p1407_p1, %p1406_p0 }
 0x90a   : > { %p1409_p3 = pnand %p1408_p2, %p1402_p13 }
 0x974   : > { %v1176_v34 = vpop.permute.xlu0 %1175 }
 0x975   : > { %1182 = vst.msk [vmem:[%s1601_s21] sm:$0xff] %vm1181_vm12, %v1176_v34  ;;  %v1178_v17 = vpop.permute.xlu1 %1177 }
 0x976   : > { %1183 = vst.msk [vmem:[%s1601_s21 + $0x8] sm:$0xff] %vm1181_vm12, %v1178_v17 }
 0x977   : > { %1412 = shalt.err (!%p1409_p3)
}
 0x978   : > { %s1413_s21 = scalar_lea.hbm %s1746_s22, 256  ;;  %s1417_s16 = scalar_lea.hbm %s1809_s13, 512 }
 0x979   : > { %p1414_p4 = scmp.ne.s32.totalorder %s1746_s22, %s1413_s21  ;;  %p1418_p9 = scmp.lt.u32.totalorder %s1746_s22, %s1809_s13 }
 0x97a   : > { %p1419_p10 = scmp.lt.u32.totalorder %s1417_s16, %s1413_s21  ;;  %p1421_p12 = scmp.lt.u32.totalorder %s1413_s21, %s1746_s22 }
 0x97b   : > { %p1415_p7 = pnand %p1414_p4, %p1578_p5 }
 0x97c   : > { %p1420_p11 = por %p1419_p10, %p1418_p9 }
 0x97d   : > { %p1416_p8 = pneg %p1415_p7 }
 0x97e   : > { %p1422_p13 = por %p1421_p12, %p1420_p11 }
 0x980   : > { %p1423_p0 = pnand %p1422_p13, %p1416_p8 }
 0x982   : > { %1426 = shalt.err (!%p1423_p0)
}
 0x983   : > { %s1469_s29 = smov 128   ;;  %s1819_s24 = smov 8  }
 0x984   : > { %1354 = dma.vmem_to_hbm [thread:$0]  (%p1578_p5), %s1748_s30, 256, %s1746_s22, %s1754_s0, %s1469_s29, %s1469_s29, %s1819_s24  }
 0x985 PF: > { %p1360_p1 = scmp.ge.s32.totalorder %s1461_s28, 2  ;;  %s1213_s1 = sand.u32 1, %s1449_s25  }
 0x986   : > { %s1214_s21 = scalar_lea.sflag [#allocation3], %s1213_s1 }
 0x987   : > { %p1357_p2 = pnand %p1360_p1, %p1582_p6 }
 0x989   : > { %1444 = dma.done.wait (!%p1357_p2), %s1214_s21, 256  }
 0x98a   : > { %1446 = vsyncadd (!%p1357_p2), %s1214_s21, 4294967040  ;;  %p23_p3 = scmp.ge.s32.totalorder %s1565_s14, 4   ;;  %s1820_s25 = smov %s1453_s26 }
 0x98b   : > { %s1821_s26 = smov %s1457_s27  ;;  %s1822_s27 = smov %s1576_s17 }
 0x98c   : > { %s1823_s28 = smov %s1565_s14  ;;  %25 = sbr.rel (!%p23_p3) target bundleno = 6 (0x6), region = 107 }
 0x993   :  { %1219 = vsyncpa [#allocation3], 1 }
 0x994   :  { %1221 = vsyncpa [#allocation3 + $0x1], 1 }

</bundles_post_ra>
